<compile_context>
chip_gen: v6e
topology: v6e:2x2x1
jax: 0.10.0
libtpu: 0.0.40
codegen_flags: <defaults>
</compile_context>

<pallas_src>
import functools

import jax
import jax.numpy as jnp
from jax.experimental import pallas as pl
from jax.experimental.pallas import tpu as pltpu


def _round_up(x, m):
    return ((x + m - 1) // m) * m


def _sublane_multiple(dtype):
    """Native sublane tile height for a dtype (f32: 8, bf16: 16, 8-bit: 32)."""
    itemsize = jnp.dtype(dtype).itemsize
    if itemsize >= 4:
        return 8
    if itemsize == 2:
        return 16
    return 32


def _vmem_capacity_bytes():
    try:
        return int(pltpu.get_tpu_info().vmem_capacity_bytes)
    except Exception:
        return 128 * 1024 * 1024  # v5e/v6e default if query unavailable


def _choose_tile_rows(M, H, dtype):
    """Pick the row-tile height and a VMEM budget for the pipeline."""
    sub = _sublane_multiple(dtype)
    itemsize = jnp.dtype(dtype).itemsize

    vmem_cap = _vmem_capacity_bytes()
    # Leave headroom; cap at ~100 MiB (v5e/v6e) -> ~48 MiB on v7x's 64 MiB VMEM.
    budget = min(vmem_cap - 16 * 1024 * 1024, 100 * 1024 * 1024)
    budget = max(budget, 8 * 1024 * 1024)

    # Per-row VMEM cost: double-buffered input + output blocks (pipeline) plus
    # ~2 live f32 copies of the tile from the in-kernel upcast / centering.
    bytes_per_row = 4 * H * itemsize + 8 * H
    tm_max = max(sub, (budget // bytes_per_row) // sub * sub)

    # Target ~8 MiB of input traffic per grid step (good even for v7x HBM BW).
    target_bytes = 8 * 1024 * 1024
    tm_target = _round_up(max(1, target_bytes // max(1, H * itemsize)), sub)

    tm = min(tm_target, tm_max, _round_up(M, sub))
    tm = max(tm, sub)
    return tm, budget


def _layernorm_kernel(x_ref, gamma_ref, beta_ref, o_ref, *, eps):
    # x tile: [tm, H]; gamma/beta: [1, H] f32 (pre-cast outside, broadcast over rows)
    x = x_ref[...].astype(jnp.float32)
    u = jnp.mean(x, axis=-1, keepdims=True)
    xc = x - u
    s = jnp.mean(xc * xc, axis=-1, keepdims=True)
    inv = jax.lax.rsqrt(s + eps)            # EUP rsqrt, avoids VPU divide
    y = xc * inv
    o_ref[...] = (gamma_ref[...] * y + beta_ref[...]).astype(o_ref.dtype)


def layer_norm(x, weight, bias, *, eps=1e-12):
    """LayerNorm over the last axis of x (any leading shape).

    weight, bias: [hidden] parameters (gamma, beta). eps defaults to the
    module's 1e-12 (TF-style, inside the sqrt).
    """
    orig_shape = x.shape
    H = orig_shape[-1]
    M = 1
    for d in orig_shape[:-1]:
        M *= d

    x2d = x.reshape(M, H)
    # Cast params to f32 once here instead of every grid step inside the kernel.
    gamma2d = weight.astype(jnp.float32).reshape(1, H)
    beta2d = bias.astype(jnp.float32).reshape(1, H)

    tm, vmem_budget = _choose_tile_rows(M, H, x.dtype)
    grid = (pl.cdiv(M, tm),)   # ragged last block: padded reads, masked writes

    kernel = functools.partial(_layernorm_kernel, eps=eps)

    itemsize = jnp.dtype(x.dtype).itemsize
    cost = pl.CostEstimate(
        flops=8 * M * H,                         # mean/var/normalize/affine
        transcendentals=M,                       # one rsqrt per row
        bytes_accessed=2 * M * H * itemsize + 2 * H * 4,
    )

    out = pl.pallas_call(
        kernel,
        out_shape=jax.ShapeDtypeStruct((M, H), x.dtype),
        grid_spec=pltpu.PrefetchScalarGridSpec(
            num_scalar_prefetch=0,
            grid=grid,
            in_specs=[
                pl.BlockSpec((tm, H), lambda i: (i, 0)),   # x row tile
                pl.BlockSpec((1, H), lambda i: (0, 0)),    # gamma (resident)
                pl.BlockSpec((1, H), lambda i: (0, 0)),    # beta  (resident)
            ],
            out_specs=pl.BlockSpec((tm, H), lambda i: (i, 0)),
        ),
        compiler_params=pltpu.CompilerParams(
            dimension_semantics=("parallel",),   # 2-TC sharding on v7x
            vmem_limit_bytes=int(vmem_budget),
        ),
        cost_estimate=cost,
    )(x2d, gamma2d, beta2d)

    return out.reshape(orig_shape)


def _reference(x, weight, bias, eps=1e-12):
    u = jnp.mean(x, axis=-1, keepdims=True)
    s = jnp.mean((x - u) ** 2, axis=-1, keepdims=True)
    return weight * ((x - u) / jnp.sqrt(s + eps)) + bias


if __name__ == "__main__":
    key = jax.random.PRNGKey(0)
    kx, kw, kb = jax.random.split(key, 3)

    B, S, H = 2, 8, 128   # small, TPU-tile-aligned shapes
    x = jax.random.normal(kx, (B, S, H), jnp.float32)
    weight = 1.0 + 0.1 * jax.random.normal(kw, (H,), jnp.float32)
    bias = 0.1 * jax.random.normal(kb, (H,), jnp.float32)

    out = jax.block_until_ready(layer_norm(x, weight, bias))
    ref = _reference(x, weight, bias)
    assert out.shape == x.shape
    assert jnp.allclose(out, ref, atol=1e-4, rtol=1e-4), "mismatch vs reference"

    # Ragged row count (M not a multiple of the tile) exercises the no-pad path.
    x2 = jax.random.normal(kb, (3, 5, H), jnp.float32)
    out2 = jax.block_until_ready(layer_norm(x2, weight, bias))
    ref2 = _reference(x2, weight, bias)
    assert jnp.allclose(out2, ref2, atol=1e-4, rtol=1e-4), "ragged mismatch"

    print("KERNEL_OK")
</pallas_src>

<mosaic_0001>
module attributes {stable_mosaic.version = 11 : i64} {
  func.func @_layernorm_kernel(%arg0: i32, %arg1: memref<16x128xf32, #tpu.memory_space<vmem>>, %arg2: memref<1x128xf32, #tpu.memory_space<vmem>>, %arg3: memref<1x128xf32, #tpu.memory_space<vmem>>, %arg4: memref<16x128xf32, #tpu.memory_space<vmem>>) attributes {dimension_semantics = [#tpu.dimension_semantics<parallel>], iteration_bounds = array<i64: 1>, scalar_prefetch = 0 : i64, scratch_operands = 0 : i64, tpu.core_type = #tpu.core_type<tc>, window_params = [{transform_indices = @transform_0, window_bounds = array<i64: 16, 128>}, {pipeline_mode = #tpu.pipeline_mode<synchronous>, transform_indices = @transform_1, window_bounds = array<i64: 1, 128>}, {pipeline_mode = #tpu.pipeline_mode<synchronous>, transform_indices = @transform_2, window_bounds = array<i64: 1, 128>}, {transform_indices = @transform_3, window_bounds = array<i64: 16, 128>}]} {
    %c0 = arith.constant 0 : index
    %c0_0 = arith.constant 0 : index
    %0 = vector.load %arg1[%c0, %c0_0] : memref<16x128xf32, #tpu.memory_space<vmem>>, vector<16x128xf32>
    %cst = arith.constant dense<0.000000e+00> : vector<16xf32>
    %1 = vector.multi_reduction <add>, %0, %cst [1] : vector<16x128xf32> to vector<16xf32>
    %2 = vector.shape_cast %1 : vector<16xf32> to vector<16x1xf32>
    %cst_1 = arith.constant 1.280000e+02 : f32
    %3 = vector.broadcast %cst_1 : f32 to vector<16x1xf32>
    %4 = arith.divf %2, %3 : vector<16x1xf32>
    %5 = vector.broadcast %4 : vector<16x1xf32> to vector<16x128xf32>
    %6 = arith.subf %0, %5 : vector<16x128xf32>
    %7 = arith.mulf %6, %6 : vector<16x128xf32>
    %cst_2 = arith.constant dense<0.000000e+00> : vector<16xf32>
    %8 = vector.multi_reduction <add>, %7, %cst_2 [1] : vector<16x128xf32> to vector<16xf32>
    %9 = vector.shape_cast %8 : vector<16xf32> to vector<16x1xf32>
    %cst_3 = arith.constant 1.280000e+02 : f32
    %10 = vector.broadcast %cst_3 : f32 to vector<16x1xf32>
    %11 = arith.divf %9, %10 : vector<16x1xf32>
    %cst_4 = arith.constant 9.99999996E-13 : f32
    %12 = vector.broadcast %cst_4 : f32 to vector<16x1xf32>
    %13 = arith.addf %11, %12 : vector<16x1xf32>
    %14 = math.rsqrt %13 : vector<16x1xf32>
    %15 = vector.broadcast %14 : vector<16x1xf32> to vector<16x128xf32>
    %16 = arith.mulf %6, %15 : vector<16x128xf32>
    %c0_5 = arith.constant 0 : index
    %c0_6 = arith.constant 0 : index
    %17 = vector.load %arg2[%c0_5, %c0_6] : memref<1x128xf32, #tpu.memory_space<vmem>>, vector<1x128xf32>
    %18 = vector.broadcast %17 : vector<1x128xf32> to vector<16x128xf32>
    %19 = arith.mulf %18, %16 : vector<16x128xf32>
    %c0_7 = arith.constant 0 : index
    %c0_8 = arith.constant 0 : index
    %20 = vector.load %arg3[%c0_7, %c0_8] : memref<1x128xf32, #tpu.memory_space<vmem>>, vector<1x128xf32>
    %21 = vector.broadcast %20 : vector<1x128xf32> to vector<16x128xf32>
    %22 = arith.addf %19, %21 : vector<16x128xf32>
    %c0_9 = arith.constant 0 : index
    %c0_10 = arith.constant 0 : index
    %23 = vector.load %arg4[%c0_9, %c0_10] : memref<16x128xf32, #tpu.memory_space<vmem>>, vector<16x128xf32>
    tpu.vector_store %arg4[%c0_9, %c0_10], %22 {strides = array<i32>} : memref<16x128xf32, #tpu.memory_space<vmem>>, vector<16x128xf32>,
    return
  }
  func.func @transform_0(%arg0: i32) -> (i32, i32) {
    %c0_i32 = arith.constant 0 : i32
    %c0_i32_0 = arith.constant 0 : i32
    return %arg0, %c0_i32 : i32, i32
  }
  func.func @transform_1(%arg0: i32) -> (i32, i32) {
    %c0_i32 = arith.constant 0 : i32
    %c0_i32_0 = arith.constant 0 : i32
    %c0_i32_1 = arith.constant 0 : i32
    return %c0_i32, %c0_i32_0 : i32, i32
  }
  func.func @transform_2(%arg0: i32) -> (i32, i32) {
    %c0_i32 = arith.constant 0 : i32
    %c0_i32_0 = arith.constant 0 : i32
    %c0_i32_1 = arith.constant 0 : i32
    return %c0_i32, %c0_i32_0 : i32, i32
  }
  func.func @transform_3(%arg0: i32) -> (i32, i32) {
    %c0_i32 = arith.constant 0 : i32
    %c0_i32_0 = arith.constant 0 : i32
    return %arg0, %c0_i32 : i32, i32
  }
}

</mosaic_0001>

<bundles_post_ra>
// kernel: tpu_custom_call.1
= control target key start
LH: loop header
LB: loop body
LE: loop exit
PB: predicated region body
PF: predicated region fallthrough
CT: control target
= control target key end

     0   :  { %8 = vsyncpa [#allocation3], 0  ;;  %s187_s0 = inlined_call_operand.hbm [shape: f32[16,128], index: 0, kind: input, shape index: {}]   ;;  %s188_s1 = inlined_call_operand.vmem [shape: f32[1,128], index: 1, kind: input, shape index: {}]   ;;  %s189_s2 = inlined_call_operand.vmem [shape: f32[1,128], index: 2, kind: input, shape index: {}]   ;;  %s190_s3 = inlined_call_operand.hbm [shape: f32[16,128], index: 3, kind: output, shape index: {}]  }
   0x1   :  { %9 = vsyncpa [#allocation4], 0  ;;  %s145_s12 = smov [#allocation2]  }
   0x2   :  { %s15_s13 = sshll.u32 %s145_s12, 4  ;;  %s16_s13 = int_to_ptr.vmem [resolvable:$true] %s15_s13 }
   0x3   :  { %s109_s14 = scalar_lea.vmem %s16_s13, 256  ;;  %p114_p1 = scmp.lt.s32.totalorder %s16_s13, %s16_s13 }
   0x4   :  { %p110_p0 = scmp.ne.s32.totalorder %s16_s13, %s109_s14  ;;  %p115_p2 = scmp.lt.s32.totalorder %s109_s14, %s109_s14 }
   0x6   :  { %p116_p3 = por %p115_p2, %p114_p1 }
   0x8   :  { %p117_p4 = pnand %p116_p3, %p110_p0 }
   0xa   :  { %120 = shalt.err (!%p117_p4)
}
   0xb   :  { %s146_s15 = smov 128   ;;  %s147_s16 = smov 8  }
   0xc   :  { %21 = dma.hbm_to_vmem [thread:$0]  %s187_s0, 256, %s16_s13, [#allocation3], %s146_s15, %s146_s15, %s147_s16  }
   0xd   :  { %141 = dma.done.wait [#allocation3], 256  }
   0xe   :  { %142 = vsyncadd [#allocation3], 4294967040  ;;  %v29_v0 = vld [vmem:[#allocation2] sm:$0xff]  ;;  %v30_v1 = vld [vmem:[#allocation2 + $0x8] sm:$0xff]  ;;  %s148_s22 = smov [#allocation5]  }
   0xf   :  { %31 = vadd.xlane.f32.xlu0 %v29_v0  ;;  %v91_v17 = vld [vmem:[%s188_s1] ss:$0 sm:$0xff]  ;;  %s79_s23 = sshll.u32 %s148_s22, 4  ;;  %s80_s23 = int_to_ptr.vmem [resolvable:$true] %s79_s23 }
  0x10   :  { %v92_v19 = vld [vmem:[%s189_s2] ss:$0 sm:$0xff]  ;;  %s121_s24 = scalar_lea.vmem %s80_s23, 256  ;;  %p126_p6 = scmp.lt.s32.totalorder %s80_s23, %s80_s23 }
  0x11   :  { %p122_p5 = scmp.ne.s32.totalorder %s80_s23, %s121_s24  ;;  %p127_p7 = scmp.lt.s32.totalorder %s121_s24, %s121_s24 }
  0x13   :  { %33 = vadd.xlane.f32.xlu0 %v30_v1  ;;  %p128_p8 = por %p127_p7, %p126_p6 }
  0x15   :  { %p129_p9 = pnand %p128_p8, %p122_p5 }
  0x98   :  { %v32_v2 = vpop.xlane.xlu0 %31 }
  0x99   :  { %v36_v3 = vmul.f32 0.0078125, %v32_v2 }
  0x9b   :  { %v38_v4 = vsub.f32 %v29_v0, %v36_v3 }
  0x9c   :  { %v34_v5 = vpop.xlane.xlu0 %33 }
  0x9d   :  { %v37_v6 = vmul.f32 0.0078125, %v34_v5  ;;  %v40_v7 = vmul.f32 %v38_v4, %v38_v4 }
  0x9f   :  { %v39_v8 = vsub.f32 %v30_v1, %v37_v6  ;;  %42 = vadd.xlane.f32.xlu1 %v40_v7 }
  0xa1   :  { %v41_v9 = vmul.f32 %v39_v8, %v39_v8 }
  0xa3   :  { %44 = vadd.xlane.f32.xlu1 %v41_v9 }
 0x128   :  { %v43_v10 = vpop.xlane.xlu1 %42 }
 0x129   :  { %v46_v11 = vmul.f32 0.0078125, %v43_v10 }
 0x12b   :  { %v48_v12 = vadd.f32 1e-12, %v46_v11 }
 0x12c   :  { %v45_v13 = vpop.xlane.xlu1 %44 }
 0x12d   :  { %97 = vrsqrt.f32 %v48_v12  ;;  %v47_v14 = vmul.f32 0.0078125, %v45_v13 }
 0x12f   :  { %v49_v15 = vadd.f32 1e-12, %v47_v14 }
 0x131   :  { %99 = vrsqrt.f32 %v49_v15 }
 0x13a   :  { %v98_v16 = vpop.eup %97 }
 0x13b   :  { %v52_v18 = vmul.f32 %v98_v16, %v38_v4 }
 0x13d   :  { %v61_v20 = vmul.f32 %v91_v17, %v52_v18 }
 0x13e   :  { %v100_v21 = vpop.eup %99 }
 0x13f   :  { %v53_v22 = vmul.f32 %v100_v21, %v39_v8  ;;  %v70_v23 = vadd.f32 %v92_v19, %v61_v20 }
 0x141   :  { %v62_v24 = vmul.f32 %v91_v17, %v53_v22  ;;  %72 = vst [vmem:[#allocation5] sm:$0xff] %v70_v23 }
 0x143   :  { %v71_v25 = vadd.f32 %v92_v19, %v62_v24 }
 0x145   :  { %73 = vst [vmem:[#allocation5 + $0x8] sm:$0xff] %v71_v25 }
 0x146   :  { %132 = shalt.err (!%p129_p9)
}
 0x147   :  { %85 = dma.vmem_to_hbm [thread:$0]  %s80_s23, 256, %s190_s3, [#allocation4], %s146_s15, %s146_s15, %s147_s16  }
 0x148   :  { %143 = dma.done.wait [#allocation4], 256  }
 0x149   :  { %144 = vsyncadd [#allocation4], 4294967040 }
 0x14a   :  { %89 = vsyncpa [#allocation3], 1 }
 0x14b   :  { %90 = vsyncpa [#allocation4], 1 }

</bundles_post_ra>
